<compile_context>
chip_gen: v5e
topology: v5e:2x2
jax: 0.10.0
libtpu: 0.0.40
codegen_flags: <defaults>
</compile_context>

<pallas_src>
import functools

import jax
import jax.numpy as jnp
from jax.experimental import pallas as pl
from jax.experimental.pallas import tpu as pltpu

_LANE = 128
_SUBLANE = 8


def _round_up(x: int, m: int) -> int:
    return ((x + m - 1) // m) * m


def _make_decoder_kernel(compute_dtype):
    def kernel(z_ref, w1_ref, b1_ref, w2_ref, b2_ref, w3_ref, b3_ref, o_ref):
        # Layer 1: Linear + Tanh (MXU matmul, f32 accumulation; tanh on EUP)
        z = z_ref[...].astype(compute_dtype)
        h = jnp.dot(z, w1_ref[...].astype(compute_dtype),
                    preferred_element_type=jnp.float32)
        h = jnp.tanh(h + b1_ref[...])
        # Layer 2: Linear + Tanh
        h = jnp.dot(h.astype(compute_dtype), w2_ref[...].astype(compute_dtype),
                    preferred_element_type=jnp.float32)
        h = jnp.tanh(h + b2_ref[...])
        # Output layer: Linear + Sigmoid
        o = jnp.dot(h.astype(compute_dtype), w3_ref[...].astype(compute_dtype),
                    preferred_element_type=jnp.float32)
        o = jax.nn.sigmoid(o + b3_ref[...])
        o_ref[...] = o.astype(o_ref.dtype)

    return kernel


@functools.partial(jax.jit, static_argnames=("out_dim", "batch_tile", "compute_dtype"))
def fc_decoder_forward(z, params, out_dim, *, batch_tile=None,
                       compute_dtype=jnp.float32):
    """z: (B, latent_dim) float32. params: weights stored (in, out) + biases (1, out)."""
    w1, b1 = params["w1"], params["b1"]
    w2, b2 = params["w2"], params["b2"]
    w3, b3 = params["w3"], params["b3"]

    B, L = z.shape
    H = w1.shape[1]
    O = w3.shape[1]

    # Pad every feature dim to a lane multiple (128): lane-dense matmuls and
    # unmasked output stores. Zero padding does not change the valid outputs.
    Lp = _round_up(L, _LANE)
    Hp = _round_up(H, _LANE)
    Op = _round_up(O, _LANE)

    # Batch tile: multiple of 8 sublanes, capped so double-buffered in/out
    # tiles (plus resident weights) stay far below the v7x scoped-VMEM default.
    if batch_tile is None:
        max_tb = max(_SUBLANE, (8 * 1024 * 1024) // (2 * 4 * (Lp + Op)))
        max_tb = max(_SUBLANE, (max_tb // _SUBLANE) * _SUBLANE)
        batch_tile = min(512, max_tb, _round_up(B, _SUBLANE))
    TB = _round_up(batch_tile, _SUBLANE)
    Bp = _round_up(max(B, TB), TB)

    f32 = jnp.float32
    zp = jnp.pad(z.astype(f32), ((0, Bp - B), (0, Lp - L)))
    w1p = jnp.pad(w1.astype(f32), ((0, Lp - L), (0, Hp - H)))
    b1p = jnp.pad(b1.astype(f32).reshape(1, -1), ((0, 0), (0, Hp - H)))
    w2p = jnp.pad(w2.astype(f32), ((0, Hp - H), (0, Hp - H)))
    b2p = jnp.pad(b2.astype(f32).reshape(1, -1), ((0, 0), (0, Hp - H)))
    w3p = jnp.pad(w3.astype(f32), ((0, Hp - H), (0, Op - O)))
    b3p = jnp.pad(b3.astype(f32).reshape(1, -1), ((0, 0), (0, Op - O)))

    grid = (Bp // TB,)

    flops = 2 * Bp * (Lp * Hp + Hp * Hp + Hp * Op)
    transcendentals = Bp * (2 * Hp + Op)
    bytes_accessed = 4 * (Bp * Lp + Bp * Op
                          + Lp * Hp + Hp * Hp + Hp * Op + 2 * Hp + Op)

    flat = pl.pallas_call(
        _make_decoder_kernel(compute_dtype),
        out_shape=jax.ShapeDtypeStruct((Bp, Op), jnp.float32),
        grid=grid,
        in_specs=[
            pl.BlockSpec((TB, Lp), lambda i: (i, 0)),   # z tile (pipelined over batch)
            pl.BlockSpec((Lp, Hp), lambda i: (0, 0)),   # w1 (VMEM-resident)
            pl.BlockSpec((1, Hp), lambda i: (0, 0)),    # b1
            pl.BlockSpec((Hp, Hp), lambda i: (0, 0)),   # w2
            pl.BlockSpec((1, Hp), lambda i: (0, 0)),    # b2
            pl.BlockSpec((Hp, Op), lambda i: (0, 0)),   # w3
            pl.BlockSpec((1, Op), lambda i: (0, 0)),    # b3
        ],
        out_specs=pl.BlockSpec((TB, Op), lambda i: (i, 0)),
        compiler_params=pltpu.CompilerParams(
            dimension_semantics=("parallel",),           # megacore on v7x
            vmem_limit_bytes=32 * 1024 * 1024,
        ),
        cost_estimate=pl.CostEstimate(
            flops=flops,
            transcendentals=transcendentals,
            bytes_accessed=bytes_accessed,
        ),
    )(zp, w1p, b1p, w2p, b2p, w3p, b3p)

    # Slice off padding, then reshape exactly like x.view(-1, *self.reshape).
    out = flat[:B, :O]
    return out.reshape((-1,) + tuple(out_dim))


def init_params(key, latent_dim, hidden_dim, out_dim):
    """nn.Linear-style U(-1/sqrt(fan_in), 1/sqrt(fan_in)) init.
    Weights stored as (in_features, out_features) — i.e. torch W transposed."""
    out_features = 1
    for d in out_dim:
        out_features *= d

    def linear(k, fan_in, fan_out):
        kw, kb = jax.random.split(k)
        bound = 1.0 / jnp.sqrt(fan_in)
        w = jax.random.uniform(kw, (fan_in, fan_out), jnp.float32, -bound, bound)
        b = jax.random.uniform(kb, (1, fan_out), jnp.float32, -bound, bound)
        return w, b

    k1, k2, k3 = jax.random.split(key, 3)
    w1, b1 = linear(k1, latent_dim, hidden_dim)
    w2, b2 = linear(k2, hidden_dim, hidden_dim)
    w3, b3 = linear(k3, hidden_dim, out_features)
    return {"w1": w1, "b1": b1, "w2": w2, "b2": b2, "w3": w3, "b3": b3}


def reference_forward(z, params, out_dim):
    """Pure-JAX f32 reference (matches the torch module)."""
    h = jnp.tanh(z @ params["w1"] + params["b1"])
    h = jnp.tanh(h @ params["w2"] + params["b2"])
    o = jax.nn.sigmoid(h @ params["w3"] + params["b3"])
    return o.reshape((-1,) + tuple(out_dim))


if __name__ == "__main__":
    # Shapes consistent with fcDecoderNet(out_dim=(16,16), latent_dim=8, hidden_dim=32)
    B = 2
    latent_dim = 8
    hidden_dim = 32
    out_dim = (16, 16)

    key = jax.random.PRNGKey(0)
    kz, kp = jax.random.split(key)
    z = jax.random.normal(kz, (B, latent_dim), dtype=jnp.float32)
    params = init_params(kp, latent_dim, hidden_dim, out_dim)

    ref = reference_forward(z, params, out_dim)

    # f32 MXU path: exact module semantics.
    out = jax.block_until_ready(fc_decoder_forward(z, params, out_dim))
    assert out.shape == (B,) + out_dim, f"bad shape {out.shape}"
    assert jnp.allclose(out, ref, atol=1e-5, rtol=1e-5), "f32 mismatch vs reference"

    # bf16-operand / f32-accumulate path (fast path on v6e/v7x MXUs).
    out_bf16 = jax.block_until_ready(
        fc_decoder_forward(z, params, out_dim, compute_dtype=jnp.bfloat16))
    assert out_bf16.shape == (B,) + out_dim
    assert jnp.allclose(out_bf16, ref, atol=5e-2, rtol=0.0), "bf16 mismatch vs reference"

    print("KERNEL_OK")
</pallas_src>

<mosaic_0001>
module attributes {stable_mosaic.version = 11 : i64} {
  func.func @kernel(%arg0: i32, %arg1: memref<8x128xf32, #tpu.memory_space<vmem>>, %arg2: memref<128x128xf32, #tpu.memory_space<vmem>>, %arg3: memref<1x128xf32, #tpu.memory_space<vmem>>, %arg4: memref<128x128xf32, #tpu.memory_space<vmem>>, %arg5: memref<1x128xf32, #tpu.memory_space<vmem>>, %arg6: memref<128x256xf32, #tpu.memory_space<vmem>>, %arg7: memref<1x256xf32, #tpu.memory_space<vmem>>, %arg8: memref<8x256xf32, #tpu.memory_space<vmem>>) attributes {dimension_semantics = [#tpu.dimension_semantics<parallel>], iteration_bounds = array<i64: 1>, scalar_prefetch = 0 : i64, scratch_operands = 0 : i64, tpu.core_type = #tpu.core_type<tc>, window_params = [{transform_indices = @transform_0, window_bounds = array<i64: 8, 128>}, {pipeline_mode = #tpu.pipeline_mode<synchronous>, transform_indices = @transform_1, window_bounds = array<i64: 128, 128>}, {pipeline_mode = #tpu.pipeline_mode<synchronous>, transform_indices = @transform_2, window_bounds = array<i64: 1, 128>}, {pipeline_mode = #tpu.pipeline_mode<synchronous>, transform_indices = @transform_3, window_bounds = array<i64: 128, 128>}, {pipeline_mode = #tpu.pipeline_mode<synchronous>, transform_indices = @transform_4, window_bounds = array<i64: 1, 128>}, {pipeline_mode = #tpu.pipeline_mode<synchronous>, transform_indices = @transform_5, window_bounds = array<i64: 128, 256>}, {pipeline_mode = #tpu.pipeline_mode<synchronous>, transform_indices = @transform_6, window_bounds = array<i64: 1, 256>}, {transform_indices = @transform_7, window_bounds = array<i64: 8, 256>}]} {
    %c0 = arith.constant 0 : index
    %c0_0 = arith.constant 0 : index
    %0 = vector.load %arg1[%c0, %c0_0] : memref<8x128xf32, #tpu.memory_space<vmem>>, vector<8x128xf32>
    %c0_1 = arith.constant 0 : index
    %c0_2 = arith.constant 0 : index
    %1 = vector.load %arg2[%c0_1, %c0_2] : memref<128x128xf32, #tpu.memory_space<vmem>>, vector<128x128xf32>
    %cst = arith.constant dense<0.000000e+00> : vector<8x128xf32>
    %2 = tpu.matmul %0, %1, %cst {dimension_numbers = #tpu.dot_dimension_numbers<[1], [0], [0], [1], [0, 0, 1, 1], [], []>} : vector<8x128xf32>, vector<128x128xf32>, vector<8x128xf32> -> vector<8x128xf32>
    %c0_3 = arith.constant 0 : index
    %c0_4 = arith.constant 0 : index
    %3 = vector.load %arg3[%c0_3, %c0_4] : memref<1x128xf32, #tpu.memory_space<vmem>>, vector<1x128xf32>
    %4 = vector.broadcast %3 : vector<1x128xf32> to vector<8x128xf32>
    %5 = arith.addf %2, %4 : vector<8x128xf32>
    %6 = math.tanh %5 : vector<8x128xf32>
    %c0_5 = arith.constant 0 : index
    %c0_6 = arith.constant 0 : index
    %7 = vector.load %arg4[%c0_5, %c0_6] : memref<128x128xf32, #tpu.memory_space<vmem>>, vector<128x128xf32>
    %cst_7 = arith.constant dense<0.000000e+00> : vector<8x128xf32>
    %8 = tpu.matmul %6, %7, %cst_7 {dimension_numbers = #tpu.dot_dimension_numbers<[1], [0], [0], [1], [0, 0, 1, 1], [], []>} : vector<8x128xf32>, vector<128x128xf32>, vector<8x128xf32> -> vector<8x128xf32>
    %c0_8 = arith.constant 0 : index
    %c0_9 = arith.constant 0 : index
    %9 = vector.load %arg5[%c0_8, %c0_9] : memref<1x128xf32, #tpu.memory_space<vmem>>, vector<1x128xf32>
    %10 = vector.broadcast %9 : vector<1x128xf32> to vector<8x128xf32>
    %11 = arith.addf %8, %10 : vector<8x128xf32>
    %12 = math.tanh %11 : vector<8x128xf32>
    %c0_10 = arith.constant 0 : index
    %c0_11 = arith.constant 0 : index
    %13 = vector.load %arg6[%c0_10, %c0_11] : memref<128x256xf32, #tpu.memory_space<vmem>>, vector<128x256xf32>
    %cst_12 = arith.constant dense<0.000000e+00> : vector<8x256xf32>
    %14 = tpu.matmul %12, %13, %cst_12 {dimension_numbers = #tpu.dot_dimension_numbers<[1], [0], [0], [1], [0, 0, 1, 1], [], []>} : vector<8x128xf32>, vector<128x256xf32>, vector<8x256xf32> -> vector<8x256xf32>
    %c0_13 = arith.constant 0 : index
    %c0_14 = arith.constant 0 : index
    %15 = vector.load %arg7[%c0_13, %c0_14] : memref<1x256xf32, #tpu.memory_space<vmem>>, vector<1x256xf32>
    %16 = vector.broadcast %15 : vector<1x256xf32> to vector<8x256xf32>
    %17 = arith.addf %14, %16 : vector<8x256xf32>
    %18 = arith.negf %17 : vector<8x256xf32>
    %19 = math.exp %18 : vector<8x256xf32>
    %cst_15 = arith.constant 1.000000e+00 : f32
    %20 = vector.broadcast %cst_15 : f32 to vector<8x256xf32>
    %21 = arith.addf %20, %19 : vector<8x256xf32>
    %22 = arith.divf %20, %21 : vector<8x256xf32>
    %c0_16 = arith.constant 0 : index
    %c0_17 = arith.constant 0 : index
    %23 = vector.load %arg8[%c0_16, %c0_17] : memref<8x256xf32, #tpu.memory_space<vmem>>, vector<8x256xf32>
    tpu.vector_store %arg8[%c0_16, %c0_17], %22 {strides = array<i32>} : memref<8x256xf32, #tpu.memory_space<vmem>>, vector<8x256xf32>,
    return
  }
  func.func @transform_0(%arg0: i32) -> (i32, i32) {
    %c0_i32 = arith.constant 0 : i32
    %c0_i32_0 = arith.constant 0 : i32
    return %arg0, %c0_i32 : i32, i32
  }
  func.func @transform_1(%arg0: i32) -> (i32, i32) {
    %c0_i32 = arith.constant 0 : i32
    %c0_i32_0 = arith.constant 0 : i32
    %c0_i32_1 = arith.constant 0 : i32
    return %c0_i32, %c0_i32_0 : i32, i32
  }
  func.func @transform_2(%arg0: i32) -> (i32, i32) {
    %c0_i32 = arith.constant 0 : i32
    %c0_i32_0 = arith.constant 0 : i32
    %c0_i32_1 = arith.constant 0 : i32
    return %c0_i32, %c0_i32_0 : i32, i32
  }
  func.func @transform_3(%arg0: i32) -> (i32, i32) {
    %c0_i32 = arith.constant 0 : i32
    %c0_i32_0 = arith.constant 0 : i32
    %c0_i32_1 = arith.constant 0 : i32
    return %c0_i32, %c0_i32_0 : i32, i32
  }
  func.func @transform_4(%arg0: i32) -> (i32, i32) {
    %c0_i32 = arith.constant 0 : i32
    %c0_i32_0 = arith.constant 0 : i32
    %c0_i32_1 = arith.constant 0 : i32
    return %c0_i32, %c0_i32_0 : i32, i32
  }
  func.func @transform_5(%arg0: i32) -> (i32, i32) {
    %c0_i32 = arith.constant 0 : i32
    %c0_i32_0 = arith.constant 0 : i32
    %c0_i32_1 = arith.constant 0 : i32
    return %c0_i32, %c0_i32_0 : i32, i32
  }
  func.func @transform_6(%arg0: i32) -> (i32, i32) {
    %c0_i32 = arith.constant 0 : i32
    %c0_i32_0 = arith.constant 0 : i32
    %c0_i32_1 = arith.constant 0 : i32
    return %c0_i32, %c0_i32_0 : i32, i32
  }
  func.func @transform_7(%arg0: i32) -> (i32, i32) {
    %c0_i32 = arith.constant 0 : i32
    %c0_i32_0 = arith.constant 0 : i32
    return %arg0, %c0_i32 : i32, i32
  }
}

</mosaic_0001>

<bundles_post_ra>
// kernel: fc_decoder_forward.1
= control target key start
LH: loop header
LB: loop body
LE: loop exit
PB: predicated region body
PF: predicated region fallthrough
CT: control target
= control target key end

     0   :  { %s497_s1 = inlined_call_operand.vmem [shape: f32[128,128], index: 1, kind: input, shape index: {}]   ;;  %s498_s3 = inlined_call_operand.vmem [shape: f32[128,128], index: 3, kind: input, shape index: {}]   ;;  %s499_s2 = inlined_call_operand.vmem [shape: f32[1,128], index: 2, kind: input, shape index: {}]   ;;  %s500_s0 = inlined_call_operand.vmem [shape: f32[8,128], index: 0, kind: input, shape index: {}]   ;;  %s501_s4 = inlined_call_operand.vmem [shape: f32[1,128], index: 4, kind: input, shape index: {}]   ;;  %s502_s5 = inlined_call_operand.vmem [shape: f32[128,256], index: 5, kind: input, shape index: {}]   ;;  %s503_s6 = inlined_call_operand.vmem [shape: f32[1,256], index: 6, kind: input, shape index: {}]   ;;  %s504_s7 = inlined_call_operand.vmem [shape: f32[8,256], index: 7, kind: output, shape index: {}]  }
   0x1   :  { %v42_v0 = vld [vmem:[%s497_s1 + $0x78] sm:$0xff]  ;;  %v41_v1 = vld [vmem:[%s497_s1 + $0x70] sm:$0xff]  ;;  %v40_v2 = vld [vmem:[%s497_s1 + $0x68] sm:$0xff] }
   0x2   :  { %47 = vmatpush.msra.mxu0 %v42_v0  ;;  %v39_v3 = vld [vmem:[%s497_s1 + $0x60] sm:$0xff]  ;;  %v83_v4 = vld [vmem:[%s498_s3 + $0x78] sm:$0xff]  ;;  %v82_v6 = vld [vmem:[%s498_s3 + $0x70] sm:$0xff] }
   0x3   :  { %v38_v5 = vld [vmem:[%s497_s1 + $0x58] sm:$0xff]  ;;  %88 = vmatpush.msra.mxu1 %v83_v4  ;;  %v81_v7 = vld [vmem:[%s498_s3 + $0x68] sm:$0xff]  ;;  %v37_v8 = vld [vmem:[%s497_s1 + $0x50] sm:$0xff] }
   0x4   :  { %48 = vmatpush.msra.mxu0 %v41_v1  ;;  %v80_v9 = vld [vmem:[%s498_s3 + $0x60] sm:$0xff]  ;;  %v36_v10 = vld [vmem:[%s497_s1 + $0x48] sm:$0xff]  ;;  %v79_v11 = vld [vmem:[%s498_s3 + $0x58] sm:$0xff] }
   0x5   :  { %89 = vmatpush.msra.mxu1 %v82_v6  ;;  %v35_v12 = vld [vmem:[%s497_s1 + $0x40] sm:$0xff]  ;;  %v78_v13 = vld [vmem:[%s498_s3 + $0x50] sm:$0xff]  ;;  %v34_v14 = vld [vmem:[%s497_s1 + $0x38] sm:$0xff] }
   0x6   :  { %49 = vmatpush.msra.mxu0 %v40_v2  ;;  %v77_v15 = vld [vmem:[%s498_s3 + $0x48] sm:$0xff]  ;;  %v33_v16 = vld [vmem:[%s497_s1 + $0x30] sm:$0xff]  ;;  %v76_v17 = vld [vmem:[%s498_s3 + $0x40] sm:$0xff] }
   0x7   :  { %90 = vmatpush.msra.mxu1 %v81_v7  ;;  %v32_v18 = vld [vmem:[%s497_s1 + $0x28] sm:$0xff]  ;;  %v75_v19 = vld [vmem:[%s498_s3 + $0x38] sm:$0xff]  ;;  %v31_v20 = vld [vmem:[%s497_s1 + $0x20] sm:$0xff] }
   0x8   :  { %50 = vmatpush.msra.mxu0 %v39_v3  ;;  %v74_v21 = vld [vmem:[%s498_s3 + $0x30] sm:$0xff]  ;;  %v30_v22 = vld [vmem:[%s497_s1 + $0x18] sm:$0xff]  ;;  %v73_v23 = vld [vmem:[%s498_s3 + $0x28] sm:$0xff] }
   0x9   :  { %91 = vmatpush.msra.mxu1 %v80_v9  ;;  %v29_v24 = vld [vmem:[%s497_s1 + $0x10] sm:$0xff]  ;;  %v28_v25 = vld [vmem:[%s497_s1 + $0x8] sm:$0xff]  ;;  %v27_v26 = vld [vmem:[%s497_s1] sm:$0xff] }
   0xa   :  { %51 = vmatpush.msra.mxu0 %v38_v5  ;;  %v26_v27 = vld [vmem:[%s500_s0] sm:$0xff]  ;;  %v71_v29 = vld [vmem:[%s498_s3 + $0x18] sm:$0xff]  ;;  %v70_v30 = vld [vmem:[%s498_s3 + $0x10] sm:$0xff] }
   0xb   :  { %92 = vmatpush.msra.mxu1 %v79_v11  ;;  %v72_v28 = vld [vmem:[%s498_s3 + $0x20] sm:$0xff]  ;;  %v69_v31 = vld [vmem:[%s498_s3 + $0x8] sm:$0xff]  ;;  %v139_v33 = vld [vmem:[%s502_s5 + $0xf0] sm:$0xff] }
   0xc   :  { %52 = vmatpush.msra.mxu0 %v37_v8  ;;  %v68_v32 = vld [vmem:[%s498_s3] sm:$0xff]  ;;  %v140_v34 = vld [vmem:[%s502_s5 + $0xf8] sm:$0xff]  ;;  %147 = vmatpush.msra.mxu2 %v139_v33  ;;  %v138_v36 = vld [vmem:[%s502_s5 + $0xe8] sm:$0xff] }
   0xd   :  { %93 = vmatpush.msra.mxu1 %v78_v13  ;;  %v137_v35 = vld [vmem:[%s502_s5 + $0xe0] sm:$0xff]  ;;  %167 = vmatpush.msra.mxu3 %v140_v34  ;;  %v135_v37 = vld [vmem:[%s502_s5 + $0xd0] sm:$0xff]  ;;  %v136_v38 = vld [vmem:[%s502_s5 + $0xd8] sm:$0xff] }
   0xe   :  { %53 = vmatpush.msra.mxu0 %v36_v10  ;;  %148 = vmatpush.msra.mxu2 %v137_v35  ;;  %v133_v39 = vld [vmem:[%s502_s5 + $0xc0] sm:$0xff]  ;;  %v134_v40 = vld [vmem:[%s502_s5 + $0xc8] sm:$0xff]  ;;  %v131_v41 = vld [vmem:[%s502_s5 + $0xb0] sm:$0xff] }
   0xf   :  { %94 = vmatpush.msra.mxu1 %v77_v15  ;;  %168 = vmatpush.msra.mxu3 %v138_v36  ;;  %v132_v42 = vld [vmem:[%s502_s5 + $0xb8] sm:$0xff]  ;;  %v129_v43 = vld [vmem:[%s502_s5 + $0xa0] sm:$0xff]  ;;  %v130_v44 = vld [vmem:[%s502_s5 + $0xa8] sm:$0xff] }
  0x10   :  { %54 = vmatpush.msra.mxu0 %v35_v12  ;;  %149 = vmatpush.msra.mxu2 %v135_v37  ;;  %v127_v45 = vld [vmem:[%s502_s5 + $0x90] sm:$0xff]  ;;  %v128_v46 = vld [vmem:[%s502_s5 + $0x98] sm:$0xff]  ;;  %v125_v47 = vld [vmem:[%s502_s5 + $0x80] sm:$0xff] }
  0x11   :  { %95 = vmatpush.msra.mxu1 %v76_v17  ;;  %169 = vmatpush.msra.mxu3 %v136_v38  ;;  %v126_v48 = vld [vmem:[%s502_s5 + $0x88] sm:$0xff]  ;;  %v123_v49 = vld [vmem:[%s502_s5 + $0x70] sm:$0xff]  ;;  %v124_v50 = vld [vmem:[%s502_s5 + $0x78] sm:$0xff] }
  0x12   :  { %55 = vmatpush.msra.mxu0 %v34_v14  ;;  %150 = vmatpush.msra.mxu2 %v133_v39  ;;  %v121_v51 = vld [vmem:[%s502_s5 + $0x60] sm:$0xff]  ;;  %v122_v52 = vld [vmem:[%s502_s5 + $0x68] sm:$0xff]  ;;  %v119_v53 = vld [vmem:[%s502_s5 + $0x50] sm:$0xff] }
  0x13   :  { %96 = vmatpush.msra.mxu1 %v75_v19  ;;  %170 = vmatpush.msra.mxu3 %v134_v40  ;;  %v120_v54 = vld [vmem:[%s502_s5 + $0x58] sm:$0xff]  ;;  %v233_v55 = vld [vmem:[%s499_s2] ss:$0 sm:$0xff]  ;;  %v118_v60 = vld [vmem:[%s502_s5 + $0x48] sm:$0xff] }
  0x14   :  { %56 = vmatpush.msra.mxu0 %v33_v16  ;;  %151 = vmatpush.msra.mxu2 %v131_v41  ;;  %v117_v59 = vld [vmem:[%s502_s5 + $0x40] sm:$0xff]  ;;  %v115_v61 = vld [vmem:[%s502_s5 + $0x30] sm:$0xff]  ;;  %v116_v62 = vld [vmem:[%s502_s5 + $0x38] sm:$0xff] }
  0x15   :  { %97 = vmatpush.msra.mxu1 %v74_v21  ;;  %171 = vmatpush.msra.mxu3 %v132_v42  ;;  %v113_v63 = vld [vmem:[%s502_s5 + $0x20] sm:$0xff]  ;;  %v114_v0 = vld [vmem:[%s502_s5 + $0x28] sm:$0xff]  ;;  %v111_v1 = vld [vmem:[%s502_s5 + $0x10] sm:$0xff] }
  0x16   :  { %57 = vmatpush.msra.mxu0 %v32_v18  ;;  %152 = vmatpush.msra.mxu2 %v129_v43  ;;  %v112_v2 = vld [vmem:[%s502_s5 + $0x18] sm:$0xff]  ;;  %v109_v3 = vld [vmem:[%s502_s5] sm:$0xff]  ;;  %v110_v4 = vld [vmem:[%s502_s5 + $0x8] sm:$0xff] }
  0x17   :  { %98 = vmatpush.msra.mxu1 %v73_v23  ;;  %172 = vmatpush.msra.mxu3 %v130_v44  ;;  %v234_v5 = vld [vmem:[%s501_s4] ss:$0 sm:$0xff] }
  0x18   :  { %58 = vmatpush.msra.mxu0 %v31_v20  ;;  %153 = vmatpush.msra.mxu2 %v127_v45  ;;  %v141_v9 = vld [vmem:[%s503_s6] sm:$0x3] }
  0x19   :  { %99 = vmatpush.msra.mxu1 %v72_v28  ;;  %173 = vmatpush.msra.mxu3 %v128_v46  ;;  %v143_v10 = vperm.slane %v141_v9, 0  ;;  %v144_v11 = vperm.slane %v141_v9, 1 }
  0x1a   :  { %59 = vmatpush.msra.mxu0 %v30_v22  ;;  %154 = vmatpush.msra.mxu2 %v125_v47 }
  0x1b   :  { %100 = vmatpush.msra.mxu1 %v71_v29  ;;  %174 = vmatpush.msra.mxu3 %v126_v48 }
  0x1c   :  { %60 = vmatpush.msra.mxu0 %v29_v24  ;;  %155 = vmatpush.msra.mxu2 %v123_v49 }
  0x1d   :  { %101 = vmatpush.msra.mxu1 %v70_v30  ;;  %175 = vmatpush.msra.mxu3 %v124_v50 }
  0x1e   :  { %61 = vmatpush.msra.mxu0 %v28_v25  ;;  %156 = vmatpush.msra.mxu2 %v121_v51 }
  0x1f   :  { %102 = vmatpush.msra.mxu1 %v69_v31  ;;  %176 = vmatpush.msra.mxu3 %v122_v52 }
  0x20   :  { %62 = vmatpush.msra.mxu0 %v27_v26  ;;  %157 = vmatpush.msra.mxu2 %v119_v53 }
  0x21   :  { %63 = vmatmul.f32.vlgmr.msra.gmra.mxu0 %v26_v27  ;;  %103 = vmatpush.msra.mxu1 %v68_v32 }
  0x22   :  { %177 = vmatpush.msra.mxu3 %v120_v54  ;;  %158 = vmatpush.msra.mxu2 %v117_v59 }
  0x24   :  { %178 = vmatpush.msra.mxu3 %v118_v60  ;;  %159 = vmatpush.msra.mxu2 %v115_v61 }
  0x26   :  { %179 = vmatpush.msra.mxu3 %v116_v62  ;;  %160 = vmatpush.msra.mxu2 %v113_v63 }
  0x28   :  { %180 = vmatpush.msra.mxu3 %v114_v0  ;;  %161 = vmatpush.msra.mxu2 %v111_v1 }
  0x2a   :  { %181 = vmatpush.msra.mxu3 %v112_v2  ;;  %162 = vmatpush.msra.mxu2 %v109_v3 }
  0x2c   :  { %182 = vmatpush.msra.mxu3 %v110_v4 }
  0x9e   :  { %v64_v56 = vpop.f32.mrf.mxu0 }
  0x9f   :  { %v65_v57 = vadd.f32 %v233_v55, %v64_v56 }
  0xa1   :  { %235 = vtanh.f32 %v65_v57 }
  0xa7   :  { %v236_v58 = vpop.eup %235 }
  0xa8   :  { %104 = vmatmul.f32.vlgmr.msra.gmra.mxu1 %v236_v58 }
 0x125   :  { %v105_v6 = vpop.f32.mrf.mxu1 }
 0x126   :  { %v106_v7 = vadd.f32 %v234_v5, %v105_v6 }
 0x128   :  { %237 = vtanh.f32 %v106_v7 }
 0x12e   :  { %v238_v8 = vpop.eup %237 }
 0x12f   :  { %163 = vmatmul.f32.vlgmr.msra.gmra.mxu2 %v238_v8  ;;  %183 = vmatmul.f32.vlgmr.msra.gmra.mxu3 %v238_v8 }
 0x1b2   :  { %v164_v12 = vpop.f32.mrf.mxu2  ;;  %v184_v13 = vpop.f32.mrf.mxu3 }
 0x1b3   :  { %v165_v14 = vadd.f32 %v164_v12, %v143_v10  ;;  %v185_v15 = vadd.f32 %v184_v13, %v144_v11 }
 0x1b5   :  { %v231_v16 = vmul.f32 -1.442695, %v165_v14  ;;  %v232_v17 = vmul.f32 -1.442695, %v185_v15 }
 0x1b7   :  { %239 = vpow2.f32 %v231_v16 }
 0x1b8   :  { %241 = vpow2.f32 %v232_v17 }
 0x1bd   :  { %v240_v18 = vpop.eup %239 }
 0x1be   :  { %v242_v19 = vpop.eup %241  ;;  %v193_v20 = vadd.f32 1.0, %v240_v18 }
 0x1bf   :  { %v194_v21 = vadd.f32 1.0, %v242_v19 }
 0x1c0   :  { %243 = vrcp.f32 %v193_v20  ;;  %v206_v27 = vand.u32 2147483648, %v193_v20  ;;  %v204_v30 = vand.u32 2147483647, %v193_v20  ;;  %vm200_vm2 = vweird.f32 %v193_v20 }
 0x1c1   :  { %245 = vrcp.f32 %v194_v21  ;;  %v221_v31 = vand.u32 2147483648, %v194_v21  ;;  %v219_v33 = vand.u32 2147483647, %v194_v21  ;;  %vm215_vm4 = vweird.f32 %v194_v21 }
 0x1c2   :  { %v207_v35 = vor.u32 1.1754944e-38, %v206_v27  ;;  %vm205_vm5 = vcmp.eq.f32.partialorder %v204_v30, 8.507059e+37 }
 0x1c3   :  { %v222_v38 = vor.u32 1.1754944e-38, %v221_v31  ;;  %vm220_vm7 = vcmp.eq.f32.partialorder %v219_v33, 8.507059e+37 }
 0x1c6   :  { %v244_v22 = vpop.eup %243 }
 0x1c7   :  { %v246_v23 = vpop.eup %245  ;;  %v196_v24 = vmul.f32 %v244_v22, %v193_v20  ;;  %vm201_vm0 = vweird.f32 %v244_v22 }
 0x1c8   :  { %v211_v25 = vmul.f32 %v246_v23, %v194_v21  ;;  %vm216_vm1 = vweird.f32 %v246_v23  ;;  %vm202_vm3 = vmor %vm200_vm2, %vm201_vm0 }
 0x1c9   :  { %v197_v26 = vsub.f32 1.0, %v196_v24  ;;  %vm217_vm6 = vmor %vm215_vm4, %vm216_vm1 }
 0x1ca   :  { %v212_v28 = vsub.f32 1.0, %v211_v25 }
 0x1cb   :  { %v198_v29 = vmul.f32 %v244_v22, %v197_v26 }
 0x1cc   :  { %v213_v32 = vmul.f32 %v246_v23, %v212_v28 }
 0x1cd   :  { %v199_v34 = vadd.f32 %v244_v22, %v198_v29 }
 0x1ce   :  { %v214_v36 = vadd.f32 %v246_v23, %v213_v32 }
 0x1cf   :  { %v203_v37 = vsel %vm202_vm3, %v244_v22, %v199_v34 }
 0x1d0   :  { %v208_v39 = vsel %vm205_vm5, %v207_v35, %v203_v37  ;;  %v218_v40 = vsel %vm217_vm6, %v246_v23, %v214_v36 }
 0x1d1   :  { %225 = vst [vmem:[%s504_s7] sm:$0xff] %v208_v39  ;;  %v223_v41 = vsel %vm220_vm7, %v222_v38, %v218_v40 }
 0x1d2   :  { %226 = vst [vmem:[%s504_s7 + $0x8] sm:$0xff] %v223_v41 }

</bundles_post_ra>
